<compile_context>
chip_gen: v6e
topology: v6e:2x2x1
jax: 0.10.0
libtpu: 0.0.40
codegen_flags: <defaults>
</compile_context>

<pallas_src>
import jax
import jax.numpy as jnp
from jax import lax
from jax.experimental import pallas as pl
from jax.experimental.pallas import tpu as pltpu


def _sigmoid_eup(x):
    # Single tanh EUP op instead of exp + reciprocal on the serial critical path.
    return 0.5 * jnp.tanh(0.5 * x) + 0.5


def lstm_recurrence_kernel(gx_ref, w_hh_ref, h_out_ref, h_sc, c_sc):
    """One grid step = one chunk of Tc time steps.

    gx_ref:    (Tc, B_pad, 4H) precomputed input gates for this chunk (bias folded in).
    w_hh_ref:  (H, 4H) recurrent weight, transposed (chunk-invariant, constant block idx).
    h_out_ref: (B_pad, H) last hidden state (written on the final chunk only).
    h_sc/c_sc: (B_pad, H) VMEM scratch carrying the recurrent state across chunks.
    """
    chunk = pl.program_id(0)
    Tc, _, H4 = gx_ref.shape
    H = H4 // 4

    @pl.when(chunk == 0)
    def _():
        h_sc[...] = jnp.zeros_like(h_sc)
        c_sc[...] = jnp.zeros_like(c_sc)

    w_hh = w_hh_ref[...]  # hoisted out of the time loop

    def step(t, carry):
        h, c = carry
        # Only the recurrence-dependent matmul stays in the loop: (B_pad, H) @ (H, 4H).
        gates = gx_ref[t] + jnp.dot(h, w_hh, preferred_element_type=jnp.float32)
        i = _sigmoid_eup(gates[:, 0 * H:1 * H])
        f = _sigmoid_eup(gates[:, 1 * H:2 * H])
        g = jnp.tanh(gates[:, 2 * H:3 * H])
        o = _sigmoid_eup(gates[:, 3 * H:4 * H])
        c_new = f * c + i * g
        h_new = o * jnp.tanh(c_new)
        return (h_new, c_new)

    # Tc is kept small (<= 32) so a full unroll is safe for vreg pressure / i-mem.
    h, c = lax.fori_loop(0, Tc, step, (h_sc[...], c_sc[...]), unroll=True)

    # Carry state to the next chunk (single VMEM round trip per chunk, not per step).
    h_sc[...] = h
    c_sc[...] = c

    @pl.when(chunk == pl.num_programs(0) - 1)
    def _():
        h_out_ref[...] = h


def fc_kernel(h_ref, w_fc_ref, b_fc_ref, logits_ref):
    """h_ref: (B_pad, H); w_fc_ref: (H, tv); b_fc_ref: (1, tv); logits_ref: (B_pad, tv)."""
    logits_ref[...] = (
        jnp.dot(h_ref[...], w_fc_ref[...], preferred_element_type=jnp.float32)
        + b_fc_ref[...]
    )


def _pick_chunk(T, cap=32):
    """Largest divisor of T that is <= cap (keeps the unrolled inner loop small)."""
    tc = min(T, cap)
    while T % tc != 0:
        tc -= 1
    return tc


def lstm_predictor_forward(x_tokens, params, t_chunk=None):
    """x_tokens: (B, T) int32 token ids. Returns (B, V) f32 logits."""
    embed = params["embed"]            # (V, E)
    w_ih = params["w_ih"]              # (4H, E)  gate order [i, f, g, o]
    w_hh = params["w_hh"]              # (4H, H)
    b_ih = params["b_ih"]              # (4H,)
    b_hh = params["b_hh"]              # (4H,)
    w_fc = params["w_fc"]              # (V, H)
    b_fc = params["b_fc"]              # (V,)

    B, T = x_tokens.shape
    V, _ = embed.shape
    H = w_hh.shape[1]

    B_pad = max(8, ((B + 7) // 8) * 8)          # sublane height
    V_pad = ((V + 127) // 128) * 128            # lane-dense logits
    Tc = _pick_chunk(T) if t_chunk is None else t_chunk
    assert T % Tc == 0, "t_chunk must divide T (padded time steps would perturb the state)"

    # --- Glue (plain JAX): precompute the per-token gate table, then gather in (T,B,4H). ---
    table = embed.astype(jnp.float32) @ w_ih.T + (b_ih + b_hh)       # (V, 4H)
    gx = table[x_tokens.T]                                           # (T, B, 4H)
    gx = jnp.pad(gx, ((0, 0), (0, B_pad - B), (0, 0)))               # (T, B_pad, 4H)
    # Zero-padded batch rows stay at h = c = 0 for all steps and are sliced off at the end.

    w_hh_t = jnp.transpose(w_hh)                                      # (H, 4H)
    w_fc_t = jnp.transpose(jnp.pad(w_fc, ((0, V_pad - V), (0, 0))))   # (H, V_pad)
    b_fc_p = jnp.pad(b_fc, (0, V_pad - V)).reshape(1, V_pad)          # (1, V_pad)

    # ---- Kernel 1: recurrence, gx streamed over T-chunks, h/c carried in VMEM scratch ----
    h_last = pl.pallas_call(
        lstm_recurrence_kernel,
        out_shape=jax.ShapeDtypeStruct((B_pad, H), jnp.float32),
        grid_spec=pltpu.PrefetchScalarGridSpec(
            num_scalar_prefetch=0,
            grid=(T // Tc,),
            in_specs=[
                pl.BlockSpec((Tc, B_pad, 4 * H), lambda c: (c, 0, 0)),  # gx chunk (pipelined)
                pl.BlockSpec((H, 4 * H), lambda c: (0, 0)),             # W_hh^T (invariant)
            ],
            out_specs=pl.BlockSpec((B_pad, H), lambda c: (0, 0)),
            scratch_shapes=[
                pltpu.VMEM((B_pad, H), jnp.float32),   # h carry
                pltpu.VMEM((B_pad, H), jnp.float32),   # c carry
            ],
        ),
        compiler_params=pltpu.CompilerParams(
            dimension_semantics=("arbitrary",),        # time recurrence is serial
            vmem_limit_bytes=32 * 1024 * 1024,         # explicit scoped-VMEM budget
        ),
    )(gx, w_hh_t)

    # ---- Kernel 2: final FC, tiled over the lane-dense vocab axis ("parallel") ----
    tv = 128
    logits_pad = pl.pallas_call(
        fc_kernel,
        out_shape=jax.ShapeDtypeStruct((B_pad, V_pad), jnp.float32),
        grid_spec=pltpu.PrefetchScalarGridSpec(
            num_scalar_prefetch=0,
            grid=(V_pad // tv,),
            in_specs=[
                pl.BlockSpec((B_pad, H), lambda j: (0, 0)),
                pl.BlockSpec((H, tv), lambda j: (0, j)),
                pl.BlockSpec((1, tv), lambda j: (0, j)),
            ],
            out_specs=pl.BlockSpec((B_pad, tv), lambda j: (0, j)),
        ),
        compiler_params=pltpu.CompilerParams(
            dimension_semantics=("parallel",),
            vmem_limit_bytes=32 * 1024 * 1024,
        ),
    )(h_last, w_fc_t, b_fc_p)

    return logits_pad[:B, :V]


def reference_forward(x_tokens, params):
    """Pure-JAX reference matching PyTorch LSTM semantics (zero initial state)."""
    embed, w_ih, w_hh = params["embed"], params["w_ih"], params["w_hh"]
    b_ih, b_hh, w_fc, b_fc = params["b_ih"], params["b_hh"], params["w_fc"], params["b_fc"]
    B, T = x_tokens.shape
    H = w_hh.shape[1]
    x_emb = embed[x_tokens]            # (B, T, E)
    h = jnp.zeros((B, H), jnp.float32)
    c = jnp.zeros((B, H), jnp.float32)
    for t in range(T):
        g = x_emb[:, t, :] @ w_ih.T + h @ w_hh.T + b_ih + b_hh
        i = jax.nn.sigmoid(g[:, 0 * H:1 * H])
        f = jax.nn.sigmoid(g[:, 1 * H:2 * H])
        gg = jnp.tanh(g[:, 2 * H:3 * H])
        o = jax.nn.sigmoid(g[:, 3 * H:4 * H])
        c = f * c + i * gg
        h = o * jnp.tanh(c)
    return h @ w_fc.T + b_fc


def init_params(key, vocab_size, embed_dim, hidden_dim):
    ks = jax.random.split(key, 7)
    s = 0.1
    return {
        "embed": s * jax.random.normal(ks[0], (vocab_size, embed_dim), jnp.float32),
        "w_ih": s * jax.random.normal(ks[1], (4 * hidden_dim, embed_dim), jnp.float32),
        "w_hh": s * jax.random.normal(ks[2], (4 * hidden_dim, hidden_dim), jnp.float32),
        "b_ih": s * jax.random.normal(ks[3], (4 * hidden_dim,), jnp.float32),
        "b_hh": s * jax.random.normal(ks[4], (4 * hidden_dim,), jnp.float32),
        "w_fc": s * jax.random.normal(ks[5], (vocab_size, hidden_dim), jnp.float32),
        "b_fc": s * jax.random.normal(ks[6], (vocab_size,), jnp.float32),
    }


if __name__ == "__main__":
    VOCAB, EMBED, HIDDEN = 32, 64, 128
    B, T = 2, 8

    key = jax.random.PRNGKey(0)
    kp, kx = jax.random.split(key)
    params = init_params(kp, VOCAB, EMBED, HIDDEN)
    x_tokens = jax.random.randint(kx, (B, T), 0, VOCAB, dtype=jnp.int32)

    # t_chunk=4 exercises the multi-chunk streaming + state-carry path (grid=(2,)).
    logits = lstm_predictor_forward(x_tokens, params, t_chunk=4)
    logits = jax.block_until_ready(logits)

    ref = reference_forward(x_tokens, params)
    assert logits.shape == (B, VOCAB)
    assert jnp.allclose(logits, ref, atol=1e-4, rtol=1e-4), "mismatch vs reference"

    print("KERNEL_OK")
</pallas_src>

<mosaic_0001>
module attributes {stable_mosaic.version = 11 : i64} {
  func.func @lstm_recurrence_kernel(%arg0: i32, %arg1: memref<4x8x512xf32, #tpu.memory_space<vmem>>, %arg2: memref<128x512xf32, #tpu.memory_space<vmem>>, %arg3: memref<8x128xf32, #tpu.memory_space<vmem>>, %arg4: memref<8x128xf32, #tpu.memory_space<vmem>>, %arg5: memref<8x128xf32, #tpu.memory_space<vmem>>) attributes {dimension_semantics = [#tpu.dimension_semantics<arbitrary>], iteration_bounds = array<i64: 2>, scalar_prefetch = 0 : i64, scratch_operands = 2 : i64, tpu.core_type = #tpu.core_type<tc>, window_params = [{transform_indices = @transform_0, window_bounds = array<i64: 4, 8, 512>}, {pipeline_mode = #tpu.pipeline_mode<synchronous>, transform_indices = @transform_1, window_bounds = array<i64: 128, 512>}, {pipeline_mode = #tpu.pipeline_mode<synchronous>, transform_indices = @transform_2, window_bounds = array<i64: 8, 128>}]} {
    %c0_i32 = arith.constant 0 : i32
    %0 = arith.cmpi eq, %arg0, %c0_i32 : i32
    %1 = arith.extui %0 : i1 to i32
    %c0_i32_0 = arith.constant 0 : i32
    %2 = arith.cmpi ne, %1, %c0_i32_0 : i32
    scf.if %2 {
      %cst_60 = arith.constant 0.000000e+00 : f32
      %155 = vector.broadcast %cst_60 : f32 to vector<8x128xf32>
      %c0_61 = arith.constant 0 : index
      %c0_62 = arith.constant 0 : index
      %156 = vector.load %arg4[%c0_61, %c0_62] : memref<8x128xf32, #tpu.memory_space<vmem>>, vector<8x128xf32>
      tpu.vector_store %arg4[%c0_61, %c0_62], %155 {strides = array<i32>} : memref<8x128xf32, #tpu.memory_space<vmem>>, vector<8x128xf32>,
      %cst_63 = arith.constant 0.000000e+00 : f32
      %157 = vector.broadcast %cst_63 : f32 to vector<8x128xf32>
      %c0_64 = arith.constant 0 : index
      %c0_65 = arith.constant 0 : index
      %158 = vector.load %arg5[%c0_64, %c0_65] : memref<8x128xf32, #tpu.memory_space<vmem>>, vector<8x128xf32>
      tpu.vector_store %arg5[%c0_64, %c0_65], %157 {strides = array<i32>} : memref<8x128xf32, #tpu.memory_space<vmem>>, vector<8x128xf32>,
    } else {
    }
    %c0 = arith.constant 0 : index
    %c0_1 = arith.constant 0 : index
    %3 = vector.load %arg2[%c0, %c0_1] : memref<128x512xf32, #tpu.memory_space<vmem>>, vector<128x512xf32>
    %c0_2 = arith.constant 0 : index
    %c0_3 = arith.constant 0 : index
    %4 = vector.load %arg4[%c0_2, %c0_3] : memref<8x128xf32, #tpu.memory_space<vmem>>, vector<8x128xf32>
    %c0_4 = arith.constant 0 : index
    %c0_5 = arith.constant 0 : index
    %5 = vector.load %arg5[%c0_4, %c0_5] : memref<8x128xf32, #tpu.memory_space<vmem>>, vector<8x128xf32>
    %c0_i32_6 = arith.constant 0 : i32
    %6 = arith.index_cast %c0_i32_6 : i32 to index
    %c0_7 = arith.constant 0 : index
    %c0_8 = arith.constant 0 : index
    %7 = vector.load %arg1[%6, %c0_7, %c0_8] : memref<4x8x512xf32, #tpu.memory_space<vmem>>, vector<1x8x512xf32>
    %8 = vector.shape_cast %7 : vector<1x8x512xf32> to vector<8x512xf32>
    %cst = arith.constant dense<0.000000e+00> : vector<8x512xf32>
    %9 = tpu.matmul %4, %3, %cst {dimension_numbers = #tpu.dot_dimension_numbers<[1], [0], [0], [1], [0, 0, 1, 1], [], []>} : vector<8x128xf32>, vector<128x512xf32>, vector<8x512xf32> -> vector<8x512xf32>
    %10 = arith.addf %8, %9 : vector<8x512xf32>
    %11 = vector.extract_strided_slice %10 {offsets = [0, 0], sizes = [8, 128], strides = [1, 1]} : vector<8x512xf32> to vector<8x128xf32>
    %cst_9 = arith.constant 5.000000e-01 : f32
    %12 = vector.broadcast %cst_9 : f32 to vector<8x128xf32>
    %13 = arith.mulf %12, %11 : vector<8x128xf32>
    %14 = math.tanh %13 : vector<8x128xf32>
    %cst_10 = arith.constant 5.000000e-01 : f32
    %15 = vector.broadcast %cst_10 : f32 to vector<8x128xf32>
    %16 = arith.mulf %15, %14 : vector<8x128xf32>
    %cst_11 = arith.constant 5.000000e-01 : f32
    %17 = vector.broadcast %cst_11 : f32 to vector<8x128xf32>
    %18 = arith.addf %16, %17 : vector<8x128xf32>
    %19 = vector.extract_strided_slice %10 {offsets = [0, 128], sizes = [8, 128], strides = [1, 1]} : vector<8x512xf32> to vector<8x128xf32>
    %cst_12 = arith.constant 5.000000e-01 : f32
    %20 = vector.broadcast %cst_12 : f32 to vector<8x128xf32>
    %21 = arith.mulf %20, %19 : vector<8x128xf32>
    %22 = math.tanh %21 : vector<8x128xf32>
    %cst_13 = arith.constant 5.000000e-01 : f32
    %23 = vector.broadcast %cst_13 : f32 to vector<8x128xf32>
    %24 = arith.mulf %23, %22 : vector<8x128xf32>
    %cst_14 = arith.constant 5.000000e-01 : f32
    %25 = vector.broadcast %cst_14 : f32 to vector<8x128xf32>
    %26 = arith.addf %24, %25 : vector<8x128xf32>
    %27 = vector.extract_strided_slice %10 {offsets = [0, 256], sizes = [8, 128], strides = [1, 1]} : vector<8x512xf32> to vector<8x128xf32>
    %28 = math.tanh %27 : vector<8x128xf32>
    %29 = vector.extract_strided_slice %10 {offsets = [0, 384], sizes = [8, 128], strides = [1, 1]} : vector<8x512xf32> to vector<8x128xf32>
    %cst_15 = arith.constant 5.000000e-01 : f32
    %30 = vector.broadcast %cst_15 : f32 to vector<8x128xf32>
    %31 = arith.mulf %30, %29 : vector<8x128xf32>
    %32 = math.tanh %31 : vector<8x128xf32>
    %cst_16 = arith.constant 5.000000e-01 : f32
    %33 = vector.broadcast %cst_16 : f32 to vector<8x128xf32>
    %34 = arith.mulf %33, %32 : vector<8x128xf32>
    %cst_17 = arith.constant 5.000000e-01 : f32
    %35 = vector.broadcast %cst_17 : f32 to vector<8x128xf32>
    %36 = arith.addf %34, %35 : vector<8x128xf32>
    %37 = arith.mulf %26, %5 : vector<8x128xf32>
    %38 = arith.mulf %18, %28 : vector<8x128xf32>
    %39 = arith.addf %37, %38 : vector<8x128xf32>
    %40 = math.tanh %39 : vector<8x128xf32>
    %41 = arith.mulf %36, %40 : vector<8x128xf32>
    %c1_i32 = arith.constant 1 : i32
    %42 = arith.index_cast %c1_i32 : i32 to index
    %c0_18 = arith.constant 0 : index
    %c0_19 = arith.constant 0 : index
    %43 = vector.load %arg1[%42, %c0_18, %c0_19] : memref<4x8x512xf32, #tpu.memory_space<vmem>>, vector<1x8x512xf32>
    %44 = vector.shape_cast %43 : vector<1x8x512xf32> to vector<8x512xf32>
    %cst_20 = arith.constant dense<0.000000e+00> : vector<8x512xf32>
    %45 = tpu.matmul %41, %3, %cst_20 {dimension_numbers = #tpu.dot_dimension_numbers<[1], [0], [0], [1], [0, 0, 1, 1], [], []>} : vector<8x128xf32>, vector<128x512xf32>, vector<8x512xf32> -> vector<8x512xf32>
    %46 = arith.addf %44, %45 : vector<8x512xf32>
    %47 = vector.extract_strided_slice %46 {offsets = [0, 0], sizes = [8, 128], strides = [1, 1]} : vector<8x512xf32> to vector<8x128xf32>
    %cst_21 = arith.constant 5.000000e-01 : f32
    %48 = vector.broadcast %cst_21 : f32 to vector<8x128xf32>
    %49 = arith.mulf %48, %47 : vector<8x128xf32>
    %50 = math.tanh %49 : vector<8x128xf32>
    %cst_22 = arith.constant 5.000000e-01 : f32
    %51 = vector.broadcast %cst_22 : f32 to vector<8x128xf32>
    %52 = arith.mulf %51, %50 : vector<8x128xf32>
    %cst_23 = arith.constant 5.000000e-01 : f32
    %53 = vector.broadcast %cst_23 : f32 to vector<8x128xf32>
    %54 = arith.addf %52, %53 : vector<8x128xf32>
    %55 = vector.extract_strided_slice %46 {offsets = [0, 128], sizes = [8, 128], strides = [1, 1]} : vector<8x512xf32> to vector<8x128xf32>
    %cst_24 = arith.constant 5.000000e-01 : f32
    %56 = vector.broadcast %cst_24 : f32 to vector<8x128xf32>
    %57 = arith.mulf %56, %55 : vector<8x128xf32>
    %58 = math.tanh %57 : vector<8x128xf32>
    %cst_25 = arith.constant 5.000000e-01 : f32
    %59 = vector.broadcast %cst_25 : f32 to vector<8x128xf32>
    %60 = arith.mulf %59, %58 : vector<8x128xf32>
    %cst_26 = arith.constant 5.000000e-01 : f32
    %61 = vector.broadcast %cst_26 : f32 to vector<8x128xf32>
    %62 = arith.addf %60, %61 : vector<8x128xf32>
    %63 = vector.extract_strided_slice %46 {offsets = [0, 256], sizes = [8, 128], strides = [1, 1]} : vector<8x512xf32> to vector<8x128xf32>
    %64 = math.tanh %63 : vector<8x128xf32>
    %65 = vector.extract_strided_slice %46 {offsets = [0, 384], sizes = [8, 128], strides = [1, 1]} : vector<8x512xf32> to vector<8x128xf32>
    %cst_27 = arith.constant 5.000000e-01 : f32
    %66 = vector.broadcast %cst_27 : f32 to vector<8x128xf32>
    %67 = arith.mulf %66, %65 : vector<8x128xf32>
    %68 = math.tanh %67 : vector<8x128xf32>
    %cst_28 = arith.constant 5.000000e-01 : f32
    %69 = vector.broadcast %cst_28 : f32 to vector<8x128xf32>
    %70 = arith.mulf %69, %68 : vector<8x128xf32>
    %cst_29 = arith.constant 5.000000e-01 : f32
    %71 = vector.broadcast %cst_29 : f32 to vector<8x128xf32>
    %72 = arith.addf %70, %71 : vector<8x128xf32>
    %73 = arith.mulf %62, %39 : vector<8x128xf32>
    %74 = arith.mulf %54, %64 : vector<8x128xf32>
    %75 = arith.addf %73, %74 : vector<8x128xf32>
    %76 = math.tanh %75 : vector<8x128xf32>
    %77 = arith.mulf %72, %76 : vector<8x128xf32>
    %c2_i32 = arith.constant 2 : i32
    %78 = arith.index_cast %c2_i32 : i32 to index
    %c0_30 = arith.constant 0 : index
    %c0_31 = arith.constant 0 : index
    %79 = vector.load %arg1[%78, %c0_30, %c0_31] : memref<4x8x512xf32, #tpu.memory_space<vmem>>, vector<1x8x512xf32>
    %80 = vector.shape_cast %79 : vector<1x8x512xf32> to vector<8x512xf32>
    %cst_32 = arith.constant dense<0.000000e+00> : vector<8x512xf32>
    %81 = tpu.matmul %77, %3, %cst_32 {dimension_numbers = #tpu.dot_dimension_numbers<[1], [0], [0], [1], [0, 0, 1, 1], [], []>} : vector<8x128xf32>, vector<128x512xf32>, vector<8x512xf32> -> vector<8x512xf32>
    %82 = arith.addf %80, %81 : vector<8x512xf32>
    %83 = vector.extract_strided_slice %82 {offsets = [0, 0], sizes = [8, 128], strides = [1, 1]} : vector<8x512xf32> to vector<8x128xf32>
    %cst_33 = arith.constant 5.000000e-01 : f32
    %84 = vector.broadcast %cst_33 : f32 to vector<8x128xf32>
    %85 = arith.mulf %84, %83 : vector<8x128xf32>
    %86 = math.tanh %85 : vector<8x128xf32>
    %cst_34 = arith.constant 5.000000e-01 : f32
    %87 = vector.broadcast %cst_34 : f32 to vector<8x128xf32>
    %88 = arith.mulf %87, %86 : vector<8x128xf32>
    %cst_35 = arith.constant 5.000000e-01 : f32
    %89 = vector.broadcast %cst_35 : f32 to vector<8x128xf32>
    %90 = arith.addf %88, %89 : vector<8x128xf32>
    %91 = vector.extract_strided_slice %82 {offsets = [0, 128], sizes = [8, 128], strides = [1, 1]} : vector<8x512xf32> to vector<8x128xf32>
    %cst_36 = arith.constant 5.000000e-01 : f32
    %92 = vector.broadcast %cst_36 : f32 to vector<8x128xf32>
    %93 = arith.mulf %92, %91 : vector<8x128xf32>
    %94 = math.tanh %93 : vector<8x128xf32>
    %cst_37 = arith.constant 5.000000e-01 : f32
    %95 = vector.broadcast %cst_37 : f32 to vector<8x128xf32>
    %96 = arith.mulf %95, %94 : vector<8x128xf32>
    %cst_38 = arith.constant 5.000000e-01 : f32
    %97 = vector.broadcast %cst_38 : f32 to vector<8x128xf32>
    %98 = arith.addf %96, %97 : vector<8x128xf32>
    %99 = vector.extract_strided_slice %82 {offsets = [0, 256], sizes = [8, 128], strides = [1, 1]} : vector<8x512xf32> to vector<8x128xf32>
    %100 = math.tanh %99 : vector<8x128xf32>
    %101 = vector.extract_strided_slice %82 {offsets = [0, 384], sizes = [8, 128], strides = [1, 1]} : vector<8x512xf32> to vector<8x128xf32>
    %cst_39 = arith.constant 5.000000e-01 : f32
    %102 = vector.broadcast %cst_39 : f32 to vector<8x128xf32>
    %103 = arith.mulf %102, %101 : vector<8x128xf32>
    %104 = math.tanh %103 : vector<8x128xf32>
    %cst_40 = arith.constant 5.000000e-01 : f32
    %105 = vector.broadcast %cst_40 : f32 to vector<8x128xf32>
    %106 = arith.mulf %105, %104 : vector<8x128xf32>
    %cst_41 = arith.constant 5.000000e-01 : f32
    %107 = vector.broadcast %cst_41 : f32 to vector<8x128xf32>
    %108 = arith.addf %106, %107 : vector<8x128xf32>
    %109 = arith.mulf %98, %75 : vector<8x128xf32>
    %110 = arith.mulf %90, %100 : vector<8x128xf32>
    %111 = arith.addf %109, %110 : vector<8x128xf32>
    %112 = math.tanh %111 : vector<8x128xf32>
    %113 = arith.mulf %108, %112 : vector<8x128xf32>
    %c3_i32 = arith.constant 3 : i32
    %114 = arith.index_cast %c3_i32 : i32 to index
    %c0_42 = arith.constant 0 : index
    %c0_43 = arith.constant 0 : index
    %115 = vector.load %arg1[%114, %c0_42, %c0_43] : memref<4x8x512xf32, #tpu.memory_space<vmem>>, vector<1x8x512xf32>
    %116 = vector.shape_cast %115 : vector<1x8x512xf32> to vector<8x512xf32>
    %cst_44 = arith.constant dense<0.000000e+00> : vector<8x512xf32>
    %117 = tpu.matmul %113, %3, %cst_44 {dimension_numbers = #tpu.dot_dimension_numbers<[1], [0], [0], [1], [0, 0, 1, 1], [], []>} : vector<8x128xf32>, vector<128x512xf32>, vector<8x512xf32> -> vector<8x512xf32>
    %118 = arith.addf %116, %117 : vector<8x512xf32>
    %119 = vector.extract_strided_slice %118 {offsets = [0, 0], sizes = [8, 128], strides = [1, 1]} : vector<8x512xf32> to vector<8x128xf32>
    %cst_45 = arith.constant 5.000000e-01 : f32
    %120 = vector.broadcast %cst_45 : f32 to vector<8x128xf32>
    %121 = arith.mulf %120, %119 : vector<8x128xf32>
    %122 = math.tanh %121 : vector<8x128xf32>
    %cst_46 = arith.constant 5.000000e-01 : f32
    %123 = vector.broadcast %cst_46 : f32 to vector<8x128xf32>
    %124 = arith.mulf %123, %122 : vector<8x128xf32>
    %cst_47 = arith.constant 5.000000e-01 : f32
    %125 = vector.broadcast %cst_47 : f32 to vector<8x128xf32>
    %126 = arith.addf %124, %125 : vector<8x128xf32>
    %127 = vector.extract_strided_slice %118 {offsets = [0, 128], sizes = [8, 128], strides = [1, 1]} : vector<8x512xf32> to vector<8x128xf32>
    %cst_48 = arith.constant 5.000000e-01 : f32
    %128 = vector.broadcast %cst_48 : f32 to vector<8x128xf32>
    %129 = arith.mulf %128, %127 : vector<8x128xf32>
    %130 = math.tanh %129 : vector<8x128xf32>
    %cst_49 = arith.constant 5.000000e-01 : f32
    %131 = vector.broadcast %cst_49 : f32 to vector<8x128xf32>
    %132 = arith.mulf %131, %130 : vector<8x128xf32>
    %cst_50 = arith.constant 5.000000e-01 : f32
    %133 = vector.broadcast %cst_50 : f32 to vector<8x128xf32>
    %134 = arith.addf %132, %133 : vector<8x128xf32>
    %135 = vector.extract_strided_slice %118 {offsets = [0, 256], sizes = [8, 128], strides = [1, 1]} : vector<8x512xf32> to vector<8x128xf32>
    %136 = math.tanh %135 : vector<8x128xf32>
    %137 = vector.extract_strided_slice %118 {offsets = [0, 384], sizes = [8, 128], strides = [1, 1]} : vector<8x512xf32> to vector<8x128xf32>
    %cst_51 = arith.constant 5.000000e-01 : f32
    %138 = vector.broadcast %cst_51 : f32 to vector<8x128xf32>
    %139 = arith.mulf %138, %137 : vector<8x128xf32>
    %140 = math.tanh %139 : vector<8x128xf32>
    %cst_52 = arith.constant 5.000000e-01 : f32
    %141 = vector.broadcast %cst_52 : f32 to vector<8x128xf32>
    %142 = arith.mulf %141, %140 : vector<8x128xf32>
    %cst_53 = arith.constant 5.000000e-01 : f32
    %143 = vector.broadcast %cst_53 : f32 to vector<8x128xf32>
    %144 = arith.addf %142, %143 : vector<8x128xf32>
    %145 = arith.mulf %134, %111 : vector<8x128xf32>
    %146 = arith.mulf %126, %136 : vector<8x128xf32>
    %147 = arith.addf %145, %146 : vector<8x128xf32>
    %148 = math.tanh %147 : vector<8x128xf32>
    %149 = arith.mulf %144, %148 : vector<8x128xf32>
    %c4_i32 = arith.constant 4 : i32
    %c0_54 = arith.constant 0 : index
    %c0_55 = arith.constant 0 : index
    %150 = vector.load %arg4[%c0_54, %c0_55] : memref<8x128xf32, #tpu.memory_space<vmem>>, vector<8x128xf32>
    tpu.vector_store %arg4[%c0_54, %c0_55], %149 {strides = array<i32>} : memref<8x128xf32, #tpu.memory_space<vmem>>, vector<8x128xf32>,
    %c0_56 = arith.constant 0 : index
    %c0_57 = arith.constant 0 : index
    %151 = vector.load %arg5[%c0_56, %c0_57] : memref<8x128xf32, #tpu.memory_space<vmem>>, vector<8x128xf32>
    tpu.vector_store %arg5[%c0_56, %c0_57], %147 {strides = array<i32>} : memref<8x128xf32, #tpu.memory_space<vmem>>, vector<8x128xf32>,
    %c1_i32_58 = arith.constant 1 : i32
    %152 = arith.cmpi eq, %arg0, %c1_i32_58 : i32
    %153 = arith.extui %152 : i1 to i32
    %c0_i32_59 = arith.constant 0 : i32
    %154 = arith.cmpi ne, %153, %c0_i32_59 : i32
    scf.if %154 {
      %c0_60 = arith.constant 0 : index
      %c0_61 = arith.constant 0 : index
      %155 = vector.load %arg3[%c0_60, %c0_61] : memref<8x128xf32, #tpu.memory_space<vmem>>, vector<8x128xf32>
      tpu.vector_store %arg3[%c0_60, %c0_61], %149 {strides = array<i32>} : memref<8x128xf32, #tpu.memory_space<vmem>>, vector<8x128xf32>,
    } else {
    }
    return
  }
  func.func @transform_0(%arg0: i32) -> (i32, i32, i32) {
    %c0_i32 = arith.constant 0 : i32
    %c0_i32_0 = arith.constant 0 : i32
    %c0_i32_1 = arith.constant 0 : i32
    return %arg0, %c0_i32, %c0_i32_0 : i32, i32, i32
  }
  func.func @transform_1(%arg0: i32) -> (i32, i32) {
    %c0_i32 = arith.constant 0 : i32
    %c0_i32_0 = arith.constant 0 : i32
    %c0_i32_1 = arith.constant 0 : i32
    return %c0_i32, %c0_i32_0 : i32, i32
  }
  func.func @transform_2(%arg0: i32) -> (i32, i32) {
    %c0_i32 = arith.constant 0 : i32
    %c0_i32_0 = arith.constant 0 : i32
    %c0_i32_1 = arith.constant 0 : i32
    return %c0_i32, %c0_i32_0 : i32, i32
  }
}

</mosaic_0001>

<bundles_post_ra>
// kernel: tpu_custom_call.1
= control target key start
LH: loop header
LB: loop body
LE: loop exit
PB: predicated region body
PF: predicated region fallthrough
CT: control target
= control target key end

     0   :  { %7 = vsyncpa [#allocation5], 0  ;;  %s1825_s0 = inlined_call_operand.hbm [shape: f32[8,8,512], index: 0, kind: input, shape index: {}]   ;;  %s1826_s1 = inlined_call_operand.hbm [shape: f32[128,512], index: 1, kind: input, shape index: {}]   ;;  %s1827_s2 = inlined_call_operand.hbm [shape: f32[8,128], index: 2, kind: output, shape index: {}]  }
   0x1   :  { %9 = vsyncpa [#allocation5 + $0x1], 0 }
   0x2   :  { %10 = vsyncpa [#allocation8], 0 }
   0x3   :  { %11 = vsyncpa [#allocation6], 0  ;;  %s1264_s9 = smov 0   ;;  %s1266_s10 = smov 0  }
   0x4   :  { %s1268_s11 = smov 0   ;;  %s1270_s12 = smov 0  }
   0x5 LB: > { %s1283_s13 = sadd.s32 4294967295, %s1240_s12   ;;  %p37_p0 = scmp.ne.s32.totalorder %s1232_s10, %s1228_s9  ;;  %s1240_s12 = sphi %s1270_s12, %s1952_s12   ;;  %s1236_s11 = sphi %s1268_s11, %s1951_s11   ;;  %s1232_s10 = sphi %s1266_s10, %s1950_s10   ;;  %s1228_s9 = sphi %s1264_s9, %s1949_s9  }
   0x6   : > { %p1828_p1 = scmp.eq.s32.totalorder %s1283_s13, 0  ;;  %p989_p2 = scmp.ge.s32.totalorder %s1240_s12, 1 }
   0x7   : > { %p90_p3 = scmp.lt.s32.totalorder %s1240_s12, 3  ;;  %s1242_s16 = smov [#allocation7]  }
   0x8   : > { %p1292_p5 = por %p1828_p1, %p37_p0  ;;  %s102_s17 = sshll.u32 %s1242_s16, 4  ;;  %s103_s17 = int_to_ptr.vmem [resolvable:$true] %s102_s17 }
   0x9   : > { %p1296_p6 = pnand %p989_p2, %p90_p3  ;;  %s1309_s19 = sadd.s32 1, %s1240_s12  }
   0xa   : > { %s1875_s14 = scalar_select %p1292_p5, 1, 0 }
   0xb   : > { %s1876_s15 = scalar_select %p1296_p6, 1, 0 }
   0xc   : > { %p1029_p7 = pneg %p1296_p6  ;;  %s24_s20 = sadd.s32 1, %s1236_s11 }
   0xd   : > { %s21_s21 = ssub.s32 %s1240_s12, %s1309_s19  ;;  %s1131_s22 = scalar_lea.vmem %s103_s17, 8192 }
   0xe   : > { %p1304_p8 = pnand %p1029_p7, %p1828_p1  ;;  %p1132_p10 = scmp.ne.s32.totalorder %s103_s17, %s1131_s22 }
   0xf   : > { %p1139_p13 = scmp.lt.s32.totalorder %s103_s17, %s103_s17  ;;  %p1140_p0 = scmp.lt.s32.totalorder %s1131_s22, %s1131_s22 }
  0x10   : > { %p1122_p9 = pneg %p1304_p8 }
  0x11   : > { %p1141_p2 = por %p1140_p0, %p1139_p13 }
  0x12   : > { %p1134_p11 = pnand %p1132_p10, %p1122_p9 }
  0x14   : > { %p1135_p12 = pneg %p1134_p11 }
  0x16   : > { %p1142_p3 = pnand %p1141_p2, %p1135_p12 }
  0x18   : > { %1145 = shalt.err (!%p1142_p3)
}
  0x19   : > { %s1243_s23 = smov 512   ;;  %s1244_s24 = smov 32  }
  0x1a   : > { %1032 = dma.hbm_to_vmem [thread:$0]  (!%p1304_p8), %s1826_s1, 8192, %s103_s17, [#allocation8], %s1243_s23, %s1243_s23, %s1244_s24  }
  0x1b   : > { %p22_p7 = scmp.eq.s32.totalorder %s21_s21, 0  ;;  %p31_p9 = scmp.ne.s32.totalorder %s1236_s11, %s1232_s10 }
  0x1c   : > { %p32_p10 = scmp.eq.s32.totalorder %s1240_s12, 0  ;;  %p1038_p11 = scmp.lt.s32.totalorder %s1240_s12, 2 }
  0x1d   : > { %s1329_s27 = scalar_select %p22_p7, %s1236_s11, %s24_s20  }
  0x1e   : > { %p33_p12 = por %p32_p10, %p31_p9  ;;  %s116_s28 = sand.u32 1, %s1236_s11  }
  0x1f   : > { %s992_s29 = sshll.u32 %s116_s28, 7  ;;  %s1018_s30 = sshll.u32 %s1240_s12, 11 }
  0x20   : > { %s1336_s5 = scalar_lea.hbm %s1825_s0, %s1018_s30  ;;  %s120_s6 = scalar_lea.vmem [#allocation4], %s992_s29 }
  0x21   : > { %s128_s7 = sshll.u32 %s120_s6, 4  ;;  %p1340_p8 = pnand %p1038_p11, %p33_p12  ;;  %s1338_s7 = int_to_ptr.vmem [resolvable:$true] %s128_s7 }
  0x22   : > { %s1344_s9 = scalar_lea.sflag [#allocation5], %s116_s28  ;;  %s1146_s12 = scalar_lea.hbm %s1336_s5, 2048 }
  0x23   : > { %p1147_p13 = scmp.ne.s32.totalorder %s1336_s5, %s1146_s12  ;;  %p1148_p0 = pneg %p1340_p8 }
  0x24   : > { %s1151_s18 = scalar_lea.hbm %s1825_s0, 4096  ;;  %p1152_p7 = scmp.lt.s32.totalorder %s1336_s5, %s1825_s0 }
  0x25   : > { %p1149_p2 = pnand %p1148_p0, %p1147_p13  ;;  %p1153_p9 = scmp.lt.s32.totalorder %s1151_s18, %s1146_s12 }
  0x27   : > { %p1150_p3 = pneg %p1149_p2  ;;  %p1154_p10 = por %p1153_p9, %p1152_p7 }
  0x29   : > { %p1155_p11 = pnand %p1154_p10, %p1150_p3 }
  0x2b   : > { %1158 = shalt.err (!%p1155_p11)
}
  0x2c   : > { %s1159_s22 = scalar_lea.vmem %s1338_s7, 2048  ;;  %s1245_s25 = smov [#allocation4]  }
  0x2d   : > { %p1160_p12 = scmp.ne.s32.totalorder %s1338_s7, %s1159_s22  ;;  %s1164_s26 = sshll.u32 %s1245_s25, 4  ;;  %s1165_s26 = int_to_ptr.vmem [resolvable:$false] %s1164_s26 }
  0x2e   : > { %s1166_s28 = scalar_lea.vmem %s1165_s26, 4096  ;;  %p1167_p2 = scmp.lt.s32.totalorder %s1338_s7, %s1165_s26 }
  0x2f   : > { %p1162_p4 = pnand %p1160_p12, %p1148_p0  ;;  %p1168_p1 = scmp.lt.s32.totalorder %s1166_s28, %s1159_s22 }
  0x31   : > { %p1163_p13 = pneg %p1162_p4  ;;  %p1169_p5 = por %p1168_p1, %p1167_p2 }
  0x33   : > { %p1170_p6 = pnand %p1169_p5, %p1163_p13 }
  0x35   : > { %1173 = shalt.err (!%p1170_p6)
}
  0x36   : > { %1036 = dma.hbm_to_vmem [thread:$0]  (!%p1340_p8), %s1336_s5, 2048, %s1338_s7, %s1344_s9, %s1243_s23, %s1243_s23, %s1244_s24  }
  0x37   : > { %p1879_p4 = scmp.ne.s32.totalorder %s1876_s15, 0 }
  0x39   : > { %140 = sbr.rel (%p1879_p4) target bundleno = 1076 (0x434), region = 28 }
  0x3e   : > { %s142_s29 = sand.u32 1, %s1232_s10   ;;  %p1880_p1 = scmp.ne.s32.totalorder %s1875_s14, 0 }
  0x3f   : > { %s997_s30 = sshll.u32 %s142_s29, 7  ;;  %s143_s3 = scalar_lea.sflag [#allocation5], %s142_s29 }
  0x40   : > { %s1371_s4 = scalar_lea.vmem [#allocation4], %s997_s30 }
  0x41   : > { %1215 = dma.done.wait (%p1880_p1), %s143_s3, 2048  }
  0x42   : > { %1217 = vsyncadd (%p1880_p1), %s143_s3, 4294965248  ;;  %p1881_p5 = scmp.eq.s32.totalorder %s1283_s13, 0 }
  0x44   : > { %1219 = dma.done.wait (%p1881_p5), [#allocation8], 8192   ;;  %p1882_p6 = pmov %p1881_p5 }
  0x45   : > { %p1883_p8 = scmp.ne.s32.totalorder %s1283_s13, 0 }
  0x46   : > { %1221 = vsyncadd (%p1882_p6), [#allocation8], 4294959104 }
  0x47   : > { %170 = sbr.rel (%p1883_p8) target bundleno = 78 (0x4e), region = 40 }
  0x4c   : > { %v1246_v0 = vmov 0.0  }
  0x4d   : > { %171 = vst [vmem:[#allocation2] sm:$0xff] %v1246_v0  ;;  %172 = vst [vmem:[#allocation3] sm:$0xff] %v1246_v0 }
  0x4e PF: > { %v1383_v1 = vld [vmem:[#allocation7 + $0x1e8] sm:$0xff]  ;;  %v1385_v2 = vld [vmem:[#allocation7 + $0x1e0] sm:$0xff]  ;;  %v1831_v5 = vmov 0.0   ;;  %v1396_v7 = vld [vmem:[#allocation7 + $0x1f8] sm:$0xff]  ;;  %p1012_p0 = scmp.ne.s32.totalorder %s1283_s13, 1 }
  0x4f   : > { %1884 = vst [vmem:[#allocation13_spill] sm:$0xff] %v1383_v1  ;;  %v1387_v3 = vld [vmem:[#allocation7 + $0x1c8] sm:$0xff]  ;;  %243 = vmatprep.subr.mxu0 %v1383_v1  ;;  %v1390_v4 = vld [vmem:[#allocation7 + $0x1c0] sm:$0xff]  ;;  %307 = vmatprep.mubr.f32.mxu0 %v1831_v5  ;;  %1885 = vst [vmem:[#allocation14_spill] sm:$0xff] %v1396_v7 }
  0x50   : > { %244 = vmatpush1.msra.mxu0 %v1385_v2  ;;  %v1394_v6 = vld [vmem:[#allocation7 + $0x1a8] sm:$0xff]  ;;  %378 = vmatprep.mubr.f32.mxu1 %v1831_v5  ;;  %v1400_v8 = vld [vmem:[#allocation7 + $0x1a0] sm:$0xff]  ;;  %v1403_v9 = vld [vmem:[#allocation7 + $0x1f0] sm:$0xff] }
  0x51   : > { %245 = vmatprep.subr.mxu0 %v1387_v3  ;;  %314 = vmatprep.subr.mxu1 %v1396_v7  ;;  %v1405_v10 = vld [vmem:[#allocation7 + $0x1d8] sm:$0xff]  ;;  %v1408_v11 = vld [vmem:[#allocation7 + $0x188] sm:$0xff]  ;;  %v1411_v12 = vld [vmem:[#allocation7 + $0x1d0] sm:$0xff] }
  0x52   : > { %246 = vmatpush1.msra.mxu0 %v1390_v4  ;;  %315 = vmatpush1.msra.mxu1 %v1403_v9  ;;  %v1414_v13 = vld [vmem:[#allocation7 + $0x180] sm:$0xff]  ;;  %v1417_v14 = vld [vmem:[#allocation7 + $0x1b8] sm:$0xff]  ;;  %v1419_v15 = vld [vmem:[#allocation7 + $0x1b0] sm:$0xff] }
  0x53   : > { %247 = vmatprep.subr.mxu0 %v1394_v6  ;;  %316 = vmatprep.subr.mxu1 %v1405_v10  ;;  %v1422_v16 = vld [vmem:[#allocation7 + $0x168] sm:$0xff]  ;;  %v1425_v17 = vld [vmem:[#allocation7 + $0x198] sm:$0xff]  ;;  %v1428_v18 = vld [vmem:[#allocation7 + $0x160] sm:$0xff] }
  0x54   : > { %248 = vmatpush1.msra.mxu0 %v1400_v8  ;;  %317 = vmatpush1.msra.mxu1 %v1411_v12  ;;  %v1431_v19 = vld [vmem:[#allocation7 + $0x190] sm:$0xff]  ;;  %v1434_v20 = vld [vmem:[#allocation7 + $0x148] sm:$0xff]  ;;  %v1437_v21 = vld [vmem:[#allocation7 + $0x178] sm:$0xff] }
  0x55   : > { %249 = vmatprep.subr.mxu0 %v1408_v11  ;;  %318 = vmatprep.subr.mxu1 %v1417_v14  ;;  %v1440_v22 = vld [vmem:[#allocation7 + $0x140] sm:$0xff]  ;;  %v1443_v23 = vld [vmem:[#allocation7 + $0x170] sm:$0xff]  ;;  %v1446_v24 = vld [vmem:[#allocation7 + $0x128] sm:$0xff] }
  0x56   : > { %250 = vmatpush1.msra.mxu0 %v1414_v13  ;;  %319 = vmatpush1.msra.mxu1 %v1419_v15  ;;  %v1449_v25 = vld [vmem:[#allocation7 + $0x158] sm:$0xff]  ;;  %v1452_v26 = vld [vmem:[#allocation7 + $0x120] sm:$0xff]  ;;  %v1455_v27 = vld [vmem:[#allocation7 + $0x150] sm:$0xff] }
  0x57   : > { %251 = vmatprep.subr.mxu0 %v1422_v16  ;;  %320 = vmatprep.subr.mxu1 %v1425_v17  ;;  %v1458_v28 = vld [vmem:[#allocation7 + $0x108] sm:$0xff]  ;;  %v1461_v29 = vld [vmem:[#allocation7 + $0x138] sm:$0xff]  ;;  %v1464_v30 = vld [vmem:[#allocation7 + $0x100] sm:$0xff] }
  0x58   : > { %252 = vmatpush1.msra.mxu0 %v1428_v18  ;;  %321 = vmatpush1.msra.mxu1 %v1431_v19  ;;  %v1467_v31 = vld [vmem:[#allocation7 + $0x130] sm:$0xff]  ;;  %v1470_v32 = vld [vmem:[#allocation7 + $0xe8] sm:$0xff]  ;;  %v1473_v33 = vld [vmem:[#allocation7 + $0x118] sm:$0xff] }
  0x59   : > { %253 = vmatprep.subr.mxu0 %v1434_v20  ;;  %322 = vmatprep.subr.mxu1 %v1437_v21  ;;  %v1476_v34 = vld [vmem:[#allocation7 + $0xe0] sm:$0xff]  ;;  %v1479_v35 = vld [vmem:[#allocation7 + $0x110] sm:$0xff]  ;;  %v1482_v36 = vld [vmem:[#allocation7 + $0xc8] sm:$0xff] }
  0x5a   : > { %254 = vmatpush1.msra.mxu0 %v1440_v22  ;;  %323 = vmatpush1.msra.mxu1 %v1443_v23  ;;  %v1485_v37 = vld [vmem:[#allocation7 + $0xf8] sm:$0xff]  ;;  %v1488_v38 = vld [vmem:[#allocation7 + $0xc0] sm:$0xff]  ;;  %v1491_v39 = vld [vmem:[#allocation7 + $0xf0] sm:$0xff] }
  0x5b   : > { %255 = vmatprep.subr.mxu0 %v1446_v24  ;;  %324 = vmatprep.subr.mxu1 %v1449_v25  ;;  %v1494_v40 = vld [vmem:[#allocation7 + $0xa8] sm:$0xff]  ;;  %v1497_v41 = vld [vmem:[#allocation7 + $0xd8] sm:$0xff]  ;;  %v1500_v42 = vld [vmem:[#allocation7 + $0xa0] sm:$0xff] }
  0x5c   : > { %256 = vmatpush1.msra.mxu0 %v1452_v26  ;;  %325 = vmatpush1.msra.mxu1 %v1455_v27  ;;  %v1503_v43 = vld [vmem:[#allocation7 + $0xd0] sm:$0xff]  ;;  %v1506_v44 = vld [vmem:[#allocation7 + $0x88] sm:$0xff]  ;;  %v1509_v45 = vld [vmem:[#allocation7 + $0xb8] sm:$0xff] }
  0x5d   : > { %257 = vmatprep.subr.mxu0 %v1458_v28  ;;  %326 = vmatprep.subr.mxu1 %v1461_v29  ;;  %v1512_v46 = vld [vmem:[#allocation7 + $0x80] sm:$0xff]  ;;  %v1515_v47 = vld [vmem:[#allocation7 + $0xb0] sm:$0xff]  ;;  %v1518_v48 = vld [vmem:[#allocation7 + $0x68] sm:$0xff] }
  0x5e   : > { %258 = vmatpush1.msra.mxu0 %v1464_v30  ;;  %327 = vmatpush1.msra.mxu1 %v1467_v31  ;;  %1886 = vst [vmem:[#allocation15_spill] sm:$0xff] %v1512_v46  ;;  %1887 = vst [vmem:[#allocation16_spill] sm:$0xff] %v1518_v48  ;;  %v1521_v49 = vld [vmem:[#allocation7 + $0x98] sm:$0xff]  ;;  %v1524_v50 = vld [vmem:[#allocation7 + $0x60] sm:$0xff] }
  0x5f   : > { %259 = vmatprep.subr.mxu0 %v1470_v32  ;;  %328 = vmatprep.subr.mxu1 %v1473_v33  ;;  %1888 = vst [vmem:[#allocation17_spill] sm:$0xff] %v1521_v49  ;;  %1889 = vst [vmem:[#allocation18_spill] sm:$0xff] %v1524_v50  ;;  %v1527_v51 = vld [vmem:[#allocation7 + $0x90] sm:$0xff]  ;;  %v1530_v52 = vld [vmem:[#allocation7 + $0x48] sm:$0xff] }
  0x60   : > { %260 = vmatpush1.msra.mxu0 %v1476_v34  ;;  %329 = vmatpush1.msra.mxu1 %v1479_v35  ;;  %1890 = vst [vmem:[#allocation19_spill] sm:$0xff] %v1527_v51  ;;  %1891 = vst [vmem:[#allocation20_spill] sm:$0xff] %v1530_v52  ;;  %v1533_v53 = vld [vmem:[#allocation7 + $0x78] sm:$0xff]  ;;  %v1536_v54 = vld [vmem:[#allocation7 + $0x40] sm:$0xff] }
  0x61   : > { %261 = vmatprep.subr.mxu0 %v1482_v36  ;;  %330 = vmatprep.subr.mxu1 %v1485_v37  ;;  %1892 = vst [vmem:[#allocation21_spill] sm:$0xff] %v1533_v53  ;;  %1893 = vst [vmem:[#allocation22_spill] sm:$0xff] %v1536_v54  ;;  %v1539_v55 = vld [vmem:[#allocation7 + $0x70] sm:$0xff]  ;;  %v1542_v56 = vld [vmem:[#allocation7 + $0x28] sm:$0xff] }
  0x62   : > { %262 = vmatpush1.msra.mxu0 %v1488_v38  ;;  %331 = vmatpush1.msra.mxu1 %v1491_v39  ;;  %1894 = vst [vmem:[#allocation23_spill] sm:$0xff] %v1539_v55  ;;  %1895 = vst [vmem:[#allocation24_spill] sm:$0xff] %v1542_v56  ;;  %v1545_v57 = vld [vmem:[#allocation7 + $0x58] sm:$0xff]  ;;  %v1548_v58 = vld [vmem:[#allocation7 + $0x20] sm:$0xff] }
  0x63   : > { %263 = vmatprep.subr.mxu0 %v1494_v40  ;;  %332 = vmatprep.subr.mxu1 %v1497_v41  ;;  %1896 = vst [vmem:[#allocation25_spill] sm:$0xff] %v1545_v57  ;;  %1897 = vst [vmem:[#allocation26_spill] sm:$0xff] %v1548_v58  ;;  %v1551_v59 = vld [vmem:[#allocation7 + $0x50] sm:$0xff]  ;;  %v1554_v60 = vld [vmem:[#allocation7 + $0x8] sm:$0xff] }
  0x64   : > { %264 = vmatpush1.msra.mxu0 %v1500_v42  ;;  %333 = vmatpush1.msra.mxu1 %v1503_v43  ;;  %1898 = vst [vmem:[#allocation27_spill] sm:$0xff] %v1551_v59  ;;  %1899 = vst [vmem:[#allocation28_spill] sm:$0xff] %v1554_v60  ;;  %v1557_v61 = vld [vmem:[#allocation7 + $0x38] sm:$0xff]  ;;  %v1560_v62 = vld [vmem:[#allocation7] sm:$0xff] }
  0x65   : > { %265 = vmatprep.subr.mxu0 %v1506_v44  ;;  %334 = vmatprep.subr.mxu1 %v1509_v45  ;;  %1900 = vst [vmem:[#allocation29_spill] sm:$0xff] %v1557_v61  ;;  %1901 = vst [vmem:[#allocation30_spill] sm:$0xff] %v1560_v62  ;;  %v1563_v63 = vld [vmem:[#allocation7 + $0x30] sm:$0xff]  ;;  %v1567_v5 = vld [vmem:[#allocation7 + $0x18] sm:$0xff] }
  0x66   : > { %266 = vmatpush1.msra.mxu0 %v1512_v46  ;;  %335 = vmatpush1.msra.mxu1 %v1515_v47  ;;  %1902 = vst [vmem:[#allocation31_spill] sm:$0xff] %v1563_v63  ;;  %v237_v0 = vld [vmem:[#allocation2] sm:$0xff]  ;;  %1903 = vst [vmem:[#allocation32_spill] sm:$0xff] %v1567_v5 }
  0x67   : > { %267 = vmatprep.subr.mxu0 %v1518_v48  ;;  %336 = vmatprep.subr.mxu1 %v1521_v49 }
  0x68   : > { %268 = vmatpush1.msra.mxu0 %v1524_v50  ;;  %337 = vmatpush1.msra.mxu1 %v1527_v51 }
  0x69   : > { %269 = vmatprep.subr.mxu0 %v1530_v52  ;;  %338 = vmatprep.subr.mxu1 %v1533_v53 }
  0x6a   : > { %270 = vmatpush1.msra.mxu0 %v1536_v54  ;;  %339 = vmatpush1.msra.mxu1 %v1539_v55  ;;  %v1571_v54 = vld [vmem:[#allocation7 + $0x10] sm:$0xff] }
  0x6b   : > { %271 = vmatprep.subr.mxu0 %v1542_v56  ;;  %340 = vmatprep.subr.mxu1 %v1545_v57  ;;  %1904 = vst [vmem:[#allocation33_spill] sm:$0xff] %v1571_v54 }
  0x6c   : > { %272 = vmatpush1.msra.mxu0 %v1548_v58  ;;  %341 = vmatpush1.msra.mxu1 %v1551_v59 }
  0x6d   : > { %273 = vmatprep.subr.mxu0 %v1554_v60  ;;  %342 = vmatprep.subr.mxu1 %v1557_v61 }
  0x6e   : > { %274 = vmatpush1.msra.mxu0 %v1560_v62  ;;  %343 = vmatpush1.msra.mxu1 %v1563_v63 }
  0x6f   : > { %308 = vmatmul.mubr.f32.vlgmr.msra.gmra.mxu0 %v237_v0  ;;  %344 = vmatprep.subr.mxu1 %v1567_v5 }
  0x70   : > { %345 = vmatpush1.msra.mxu1 %v1571_v54  ;;  %412 = vmatprep.subr.mxu0 %v1383_v1 }
  0x71   : > { %379 = vmatmul.mubr.f32.vlgmr.msra.gmra.mxu1 %v237_v0  ;;  %483 = vmatprep.subr.mxu1 %v1396_v7  ;;  %v1905_v0 = vld [vmem:[#allocation22_spill] sm:$0xff] }
  0x72   : > { %413 = vmatpush1.msra.mxu0 %v1385_v2  ;;  %484 = vmatpush1.msra.mxu1 %v1403_v9 }
  0x73   : > { %414 = vmatprep.subr.mxu0 %v1387_v3  ;;  %485 = vmatprep.subr.mxu1 %v1405_v10 }
  0x74   : > { %415 = vmatpush1.msra.mxu0 %v1390_v4  ;;  %486 = vmatpush1.msra.mxu1 %v1411_v12 }
  0x75   : > { %416 = vmatprep.subr.mxu0 %v1394_v6  ;;  %487 = vmatprep.subr.mxu1 %v1417_v14 }
  0x76   : > { %417 = vmatpush1.msra.mxu0 %v1400_v8  ;;  %488 = vmatpush1.msra.mxu1 %v1419_v15 }
  0x77   : > { %418 = vmatprep.subr.mxu0 %v1408_v11  ;;  %489 = vmatprep.subr.mxu1 %v1425_v17 }
  0x78   : > { %419 = vmatpush1.msra.mxu0 %v1414_v13  ;;  %490 = vmatpush1.msra.mxu1 %v1431_v19 }
  0x79   : > { %420 = vmatprep.subr.mxu0 %v1422_v16  ;;  %491 = vmatprep.subr.mxu1 %v1437_v21 }
  0x7a   : > { %421 = vmatpush1.msra.mxu0 %v1428_v18  ;;  %492 = vmatpush1.msra.mxu1 %v1443_v23 }
  0x7b   : > { %422 = vmatprep.subr.mxu0 %v1434_v20  ;;  %493 = vmatprep.subr.mxu1 %v1449_v25 }
  0x7c   : > { %423 = vmatpush1.msra.mxu0 %v1440_v22  ;;  %494 = vmatpush1.msra.mxu1 %v1455_v27 }
  0x7d   : > { %424 = vmatprep.subr.mxu0 %v1446_v24  ;;  %495 = vmatprep.subr.mxu1 %v1461_v29 }
  0x7e   : > { %425 = vmatpush1.msra.mxu0 %v1452_v26  ;;  %496 = vmatpush1.msra.mxu1 %v1467_v31 }
  0x7f   : > { %426 = vmatprep.subr.mxu0 %v1458_v28  ;;  %497 = vmatprep.subr.mxu1 %v1473_v33 }
  0x80   : > { %427 = vmatpush1.msra.mxu0 %v1464_v30  ;;  %498 = vmatpush1.msra.mxu1 %v1479_v35 }
  0x81   : > { %428 = vmatprep.subr.mxu0 %v1470_v32  ;;  %499 = vmatprep.subr.mxu1 %v1485_v37 }
  0x82   : > { %429 = vmatpush1.msra.mxu0 %v1476_v34  ;;  %500 = vmatpush1.msra.mxu1 %v1491_v39 }
  0x83   : > { %430 = vmatprep.subr.mxu0 %v1482_v36  ;;  %501 = vmatprep.subr.mxu1 %v1497_v41 }
  0x84   : > { %431 = vmatpush1.msra.mxu0 %v1488_v38  ;;  %502 = vmatpush1.msra.mxu1 %v1503_v43 }
  0x85   : > { %432 = vmatprep.subr.mxu0 %v1494_v40  ;;  %503 = vmatprep.subr.mxu1 %v1509_v45 }
  0x86   : > { %433 = vmatpush1.msra.mxu0 %v1500_v42  ;;  %504 = vmatpush1.msra.mxu1 %v1515_v47 }
  0x87   : > { %434 = vmatprep.subr.mxu0 %v1506_v44  ;;  %505 = vmatprep.subr.mxu1 %v1521_v49 }
  0x88   : > { %435 = vmatpush1.msra.mxu0 %v1512_v46  ;;  %506 = vmatpush1.msra.mxu1 %v1527_v51 }
  0x89   : > { %436 = vmatprep.subr.mxu0 %v1518_v48  ;;  %507 = vmatprep.subr.mxu1 %v1533_v53 }
  0x8a   : > { %437 = vmatpush1.msra.mxu0 %v1524_v50  ;;  %508 = vmatpush1.msra.mxu1 %v1539_v55 }
  0x8b   : > { %438 = vmatprep.subr.mxu0 %v1530_v52  ;;  %509 = vmatprep.subr.mxu1 %v1545_v57  ;;  %v1906_v57 = vmov 0.0  }
  0x8c   : > { %439 = vmatpush1.msra.mxu0 %v1905_v0  ;;  %510 = vmatpush1.msra.mxu1 %v1551_v59  ;;  %v241_v59 = vld [vmem:[%s1371_s4 + $0x10] sm:$0xff] }
  0x8d   : > { %440 = vmatprep.subr.mxu0 %v1542_v56  ;;  %511 = vmatprep.subr.mxu1 %v1557_v61 }
  0x8e   : > { %441 = vmatpush1.msra.mxu0 %v1548_v58  ;;  %512 = vmatpush1.msra.mxu1 %v1563_v63  ;;  %v239_v58 = vld [vmem:[%s1371_s4] sm:$0xff]  ;;  %v240_v63 = vld [vmem:[%s1371_s4 + $0x8] sm:$0xff] }
  0x8f   : > { %442 = vmatprep.subr.mxu0 %v1554_v60  ;;  %513 = vmatprep.subr.mxu1 %v1567_v5 }
  0x90   : > { %443 = vmatpush1.msra.mxu0 %v1560_v62  ;;  %476 = vmatprep.mubr.f32.mxu0 %v1906_v57 }
  0x91   : > { %514 = vmatpush1.msra.mxu1 %v1571_v54  ;;  %547 = vmatprep.mubr.f32.mxu1 %v1906_v57  ;;  %v242_v54 = vld [vmem:[%s1371_s4 + $0x18] sm:$0xff] }
  0x92   : > { %581 = vmatprep.subr.mxu0 %v1383_v1  ;;  %652 = vmatprep.subr.mxu1 %v1396_v7 }
 0x12f   : > { %v309_v61 = vpop.f32.mrf.mxu0 }
 0x130   : > { %v385_v56 = vadd.f32 %v309_v61, %v239_v58  ;;  %v238_v61 = vld [vmem:[#allocation3] sm:$0xff] }
 0x131   : > { %v311_v60 = vpop.f32.mrf.mxu0  ;;  %v380_v5 = vpop.f32.mrf.mxu1 }
 0x132   : > { %v389_v0 = vmul.f32 0.5, %v385_v56  ;;  %v386_v62 = vadd.f32 %v311_v60, %v240_v63  ;;  %v387_v55 = vadd.f32 %v380_v5, %v241_v59  ;;  %v1915_v59 = vld [vmem:[#allocation25_spill] sm:$0xff] }
 0x133   : > { %v382_v57 = vpop.f32.mrf.mxu1 }
 0x134   : > { %1080 = vtanh.f32 %v389_v0  ;;  %v393_v52 = vmul.f32 0.5, %v386_v62  ;;  %v388_v1 = vadd.f32 %v382_v57, %v242_v54  ;;  %v1914_v57 = vld [vmem:[#allocation20_spill] sm:$0xff]  ;;  %v1916_v62 = vld [vmem:[#allocation22_spill] sm:$0xff]  ;;  %v1917_v0 = vld [vmem:[#allocation27_spill] sm:$0xff] }
 0x136   : > { %1082 = vtanh.f32 %v393_v52  ;;  %v398_v50 = vmul.f32 0.5, %v388_v1 }
 0x137   : > { %1084 = vtanh.f32 %v387_v55 }
 0x138   : > { %1086 = vtanh.f32 %v398_v50  ;;  %v1911_v50 = vld [vmem:[#allocation21_spill] sm:$0xff] }
 0x141   : > { %v1081_v53 = vpop.eup %1080 }
 0x142   : > { %v391_v7 = vmul.f32 0.5, %v1081_v53  ;;  %v1913_v53 = vld [vmem:[#allocation23_spill] sm:$0xff] }
 0x143   : > { %v1083_v48 = vpop.eup %1082 }
 0x144   : > { %v392_v51 = vadd.f32 0.5, %v391_v7  ;;  %v395_v46 = vmul.f32 0.5, %v1083_v48  ;;  %v1085_v58 = vpop.eup %1084  ;;  %v1907_v7 = vld [vmem:[#allocation17_spill] sm:$0xff]  ;;  %v1909_v48 = vld [vmem:[#allocation19_spill] sm:$0xff] }
 0x145   : > { %v1087_v5 = vpop.eup %1086 }
 0x146   : > { %v396_v49 = vadd.f32 0.5, %v395_v46  ;;  %v403_v60 = vmul.f32 %v1085_v58, %v392_v51  ;;  %v400_v52 = vmul.f32 0.5, %v1087_v5  ;;  %v1908_v46 = vld [vmem:[#allocation15_spill] sm:$0xff]  ;;  %v1912_v51 = vld [vmem:[#allocation18_spill] sm:$0xff]  ;;  %v1918_v58 = vld [vmem:[#allocation24_spill] sm:$0xff] }
 0x147   : > { %v1922_v5 = vld [vmem:[#allocation28_spill] sm:$0xff] }
 0x148   : > { %v402_v56 = vmul.f32 %v396_v49, %v238_v61  ;;  %v401_v55 = vadd.f32 0.5, %v400_v52  ;;  %v1910_v49 = vld [vmem:[#allocation16_spill] sm:$0xff]  ;;  %v1919_v61 = vld [vmem:[#allocation29_spill] sm:$0xff] }
 0x149   : > { %v1923_v52 = vld [vmem:[#allocation32_spill] sm:$0xff] }
 0x14a   : > { %v1649_v63 = vadd.f32 %v403_v60, %v402_v56  ;;  %v1920_v56 = vld [vmem:[#allocation26_spill] sm:$0xff]  ;;  %v1921_v60 = vld [vmem:[#allocation31_spill] sm:$0xff] }
 0x14c   : > { %1088 = vtanh.f32 %v1649_v63 }
 0x159   : > { %v1089_v54 = vpop.eup %1088 }
 0x15a   : > { %v406_v1 = vmul.f32 %v1089_v54, %v401_v55  ;;  %v1924_v55 = vld [vmem:[#allocation30_spill] sm:$0xff]  ;;  %v1925_v54 = vmov 0.0  }
 0x15c   : > { %477 = vmatmul.mubr.f32.vlgmr.msra.gmra.mxu0 %v406_v1  ;;  %548 = vmatmul.mubr.f32.vlgmr.msra.gmra.mxu1 %v406_v1  ;;  %v1926_v1 = vld [vmem:[#allocation33_spill] sm:$0xff] }
 0x15d   : > { %582 = vmatpush1.msra.mxu0 %v1385_v2  ;;  %653 = vmatpush1.msra.mxu1 %v1403_v9 }
 0x15e   : > { %583 = vmatprep.subr.mxu0 %v1387_v3  ;;  %654 = vmatprep.subr.mxu1 %v1405_v10 }
 0x15f   : > { %584 = vmatpush1.msra.mxu0 %v1390_v4  ;;  %655 = vmatpush1.msra.mxu1 %v1411_v12 }
 0x160   : > { %585 = vmatprep.subr.mxu0 %v1394_v6  ;;  %656 = vmatprep.subr.mxu1 %v1417_v14 }
 0x161   : > { %586 = vmatpush1.msra.mxu0 %v1400_v8  ;;  %657 = vmatpush1.msra.mxu1 %v1419_v15 }
 0x162   : > { %587 = vmatprep.subr.mxu0 %v1408_v11  ;;  %658 = vmatprep.subr.mxu1 %v1425_v17 }
 0x163   : > { %588 = vmatpush1.msra.mxu0 %v1414_v13  ;;  %659 = vmatpush1.msra.mxu1 %v1431_v19 }
 0x164   : > { %589 = vmatprep.subr.mxu0 %v1422_v16  ;;  %660 = vmatprep.subr.mxu1 %v1437_v21 }
 0x165   : > { %590 = vmatpush1.msra.mxu0 %v1428_v18  ;;  %661 = vmatpush1.msra.mxu1 %v1443_v23 }
 0x166   : > { %591 = vmatprep.subr.mxu0 %v1434_v20  ;;  %662 = vmatprep.subr.mxu1 %v1449_v25 }
 0x167   : > { %592 = vmatpush1.msra.mxu0 %v1440_v22  ;;  %663 = vmatpush1.msra.mxu1 %v1455_v27 }
 0x168   : > { %593 = vmatprep.subr.mxu0 %v1446_v24  ;;  %664 = vmatprep.subr.mxu1 %v1461_v29 }
 0x169   : > { %594 = vmatpush1.msra.mxu0 %v1452_v26  ;;  %665 = vmatpush1.msra.mxu1 %v1467_v31 }
 0x16a   : > { %595 = vmatprep.subr.mxu0 %v1458_v28  ;;  %666 = vmatprep.subr.mxu1 %v1473_v33 }
 0x16b   : > { %596 = vmatpush1.msra.mxu0 %v1464_v30  ;;  %667 = vmatpush1.msra.mxu1 %v1479_v35 }
 0x16c   : > { %597 = vmatprep.subr.mxu0 %v1470_v32  ;;  %668 = vmatprep.subr.mxu1 %v1485_v37 }
 0x16d   : > { %598 = vmatpush1.msra.mxu0 %v1476_v34  ;;  %669 = vmatpush1.msra.mxu1 %v1491_v39 }
 0x16e   : > { %599 = vmatprep.subr.mxu0 %v1482_v36  ;;  %670 = vmatprep.subr.mxu1 %v1497_v41 }
 0x16f   : > { %600 = vmatpush1.msra.mxu0 %v1488_v38  ;;  %671 = vmatpush1.msra.mxu1 %v1503_v43 }
 0x170   : > { %601 = vmatprep.subr.mxu0 %v1494_v40  ;;  %672 = vmatprep.subr.mxu1 %v1509_v45 }
 0x171   : > { %602 = vmatpush1.msra.mxu0 %v1500_v42  ;;  %673 = vmatpush1.msra.mxu1 %v1515_v47 }
 0x172   : > { %603 = vmatprep.subr.mxu0 %v1506_v44  ;;  %674 = vmatprep.subr.mxu1 %v1907_v7 }
 0x173   : > { %604 = vmatpush1.msra.mxu0 %v1908_v46  ;;  %675 = vmatpush1.msra.mxu1 %v1909_v48 }
 0x174   : > { %605 = vmatprep.subr.mxu0 %v1910_v49  ;;  %676 = vmatprep.subr.mxu1 %v1911_v50 }
 0x175   : > { %606 = vmatpush1.msra.mxu0 %v1912_v51  ;;  %677 = vmatpush1.msra.mxu1 %v1913_v53 }
 0x176   : > { %607 = vmatprep.subr.mxu0 %v1914_v57  ;;  %678 = vmatprep.subr.mxu1 %v1915_v59  ;;  %v1002_v57 = vld [vmem:[%s1371_s4 + $0x30] sm:$0xff] }
 0x177   : > { %608 = vmatpush1.msra.mxu0 %v1916_v62  ;;  %679 = vmatpush1.msra.mxu1 %v1917_v0  ;;  %v1001_v0 = vld [vmem:[%s1371_s4 + $0x28] sm:$0xff] }
 0x178   : > { %609 = vmatprep.subr.mxu0 %v1918_v58  ;;  %680 = vmatprep.subr.mxu1 %v1919_v61  ;;  %v1927_v58 = vld [vmem:[#allocation13_spill] sm:$0xff]  ;;  %v1928_v61 = vld [vmem:[#allocation14_spill] sm:$0xff] }
 0x179   : > { %610 = vmatpush1.msra.mxu0 %v1920_v56  ;;  %681 = vmatpush1.msra.mxu1 %v1921_v60  ;;  %v1000_v56 = vld [vmem:[%s1371_s4 + $0x20] sm:$0xff] }
 0x17a   : > { %611 = vmatprep.subr.mxu0 %v1922_v5  ;;  %682 = vmatprep.subr.mxu1 %v1923_v52 }
 0x17b   : > { %612 = vmatpush1.msra.mxu0 %v1924_v55  ;;  %645 = vmatprep.mubr.f32.mxu0 %v1925_v54 }
 0x17c   : > { %683 = vmatpush1.msra.mxu1 %v1926_v1  ;;  %716 = vmatprep.mubr.f32.mxu1 %v1925_v54  ;;  %v1003_v1 = vld [vmem:[%s1371_s4 + $0x38] sm:$0xff] }
 0x17d   : > { %750 = vmatprep.subr.mxu0 %v1927_v58  ;;  %821 = vmatprep.subr.mxu1 %v1928_v61 }
 0x21c   : > { %v478_v60 = vpop.f32.mrf.mxu0  ;;  %v549_v55 = vpop.f32.mrf.mxu1 }
 0x21d   : > { %v554_v62 = vadd.f32 %v1000_v56, %v478_v60  ;;  %v556_v51 = vadd.f32 %v1002_v57, %v549_v55 }
 0x21e   : > { %v480_v5 = vpop.f32.mrf.mxu0  ;;  %v551_v54 = vpop.f32.mrf.mxu1 }
 0x21f   : > { %v558_v59 = vmul.f32 0.5, %v554_v62  ;;  %v555_v52 = vadd.f32 %v1001_v0, %v480_v5  ;;  %v557_v50 = vadd.f32 %v1003_v1, %v551_v54  ;;  %v1008_v54 = vld [vmem:[%s1371_s4 + $0x60] sm:$0xff] }
 0x221   : > { %1090 = vtanh.f32 %v558_v59  ;;  %v562_v53 = vmul.f32 0.5, %v555_v52  ;;  %v567_v58 = vmul.f32 0.5, %v557_v50 }
 0x223   : > { %1092 = vtanh.f32 %v562_v53 }
 0x224   : > { %1094 = vtanh.f32 %v556_v51 }
 0x225   : > { %1096 = vtanh.f32 %v567_v58  ;;  %v1009_v58 = vld [vmem:[%s1371_s4 + $0x68] sm:$0xff] }
 0x22e   : > { %v1091_v49 = vpop.eup %1090 }
 0x22f   : > { %v560_v61 = vmul.f32 0.5, %v1091_v49 }
 0x230   : > { %v1093_v48 = vpop.eup %1092 }
 0x231   : > { %v561_v46 = vadd.f32 0.5, %v560_v61  ;;  %v564_v7 = vmul.f32 0.5, %v1093_v48  ;;  %v1095_v62 = vpop.eup %1094 }
 0x232   : > { %v1097_v53 = vpop.eup %1096 }
 0x233   : > { %v565_v56 = vadd.f32 0.5, %v564_v7  ;;  %v572_v60 = vmul.f32 %v1095_v62, %v561_v46  ;;  %v569_v57 = vmul.f32 0.5, %v1097_v53 }
 0x235   : > { %v571_v0 = vmul.f32 %v565_v56, %v1649_v63  ;;  %v570_v51 = vadd.f32 0.5, %v569_v57 }
 0x237   : > { %v1723_v59 = vadd.f32 %v572_v60, %v571_v0  ;;  %v1010_v60 = vld [vmem:[%s1371_s4 + $0x70] sm:$0xff] }
 0x239   : > { %1098 = vtanh.f32 %v1723_v59 }
 0x246   : > { %v1099_v5 = vpop.eup %1098 }
 0x247   : > { %v575_v50 = vmul.f32 %v1099_v5, %v570_v51  ;;  %v1011_v51 = vld [vmem:[%s1371_s4 + $0x78] sm:$0xff] }
 0x249   : > { %646 = vmatmul.mubr.f32.vlgmr.msra.gmra.mxu0 %v575_v50  ;;  %717 = vmatmul.mubr.f32.vlgmr.msra.gmra.mxu1 %v575_v50 }
 0x24a   : > { %751 = vmatpush1.msra.mxu0 %v1385_v2  ;;  %822 = vmatpush1.msra.mxu1 %v1403_v9  ;;  %v1929_v2 = vld [vmem:[#allocation17_spill] sm:$0xff]  ;;  %v1934_v9 = vld [vmem:[#allocation18_spill] sm:$0xff] }
 0x24b   : > { %752 = vmatprep.subr.mxu0 %v1387_v3  ;;  %823 = vmatprep.subr.mxu1 %v1405_v10  ;;  %v1930_v3 = vld [vmem:[#allocation15_spill] sm:$0xff] }
 0x24c   : > { %753 = vmatpush1.msra.mxu0 %v1390_v4  ;;  %824 = vmatpush1.msra.mxu1 %v1411_v12  ;;  %v1931_v4 = vld [vmem:[#allocation19_spill] sm:$0xff]  ;;  %v1937_v12 = vld [vmem:[#allocation25_spill] sm:$0xff] }
 0x24d   : > { %754 = vmatprep.subr.mxu0 %v1394_v6  ;;  %825 = vmatprep.subr.mxu1 %v1417_v14  ;;  %v1932_v6 = vld [vmem:[#allocation16_spill] sm:$0xff]  ;;  %v1935_v10 = vld [vmem:[#allocation23_spill] sm:$0xff] }
 0x24e   : > { %755 = vmatpush1.msra.mxu0 %v1400_v8  ;;  %826 = vmatpush1.msra.mxu1 %v1419_v15  ;;  %v1933_v8 = vld [vmem:[#allocation21_spill] sm:$0xff]  ;;  %v1939_v14 = vld [vmem:[#allocation27_spill] sm:$0xff]  ;;  %v1940_v15 = vld [vmem:[#allocation24_spill] sm:$0xff] }
 0x24f   : > { %756 = vmatprep.subr.mxu0 %v1408_v11  ;;  %827 = vmatprep.subr.mxu1 %v1425_v17  ;;  %v1936_v11 = vld [vmem:[#allocation20_spill] sm:$0xff]  ;;  %v1942_v17 = vld [vmem:[#allocation26_spill] sm:$0xff] }
 0x250   : > { %757 = vmatpush1.msra.mxu0 %v1414_v13  ;;  %828 = vmatpush1.msra.mxu1 %v1431_v19  ;;  %v1938_v13 = vld [vmem:[#allocation22_spill] sm:$0xff]  ;;  %v1944_v19 = vld [vmem:[#allocation28_spill] sm:$0xff] }
 0x251   : > { %758 = vmatprep.subr.mxu0 %v1422_v16  ;;  %829 = vmatprep.subr.mxu1 %v1437_v21  ;;  %v1941_v16 = vld [vmem:[#allocation29_spill] sm:$0xff]  ;;  %v1946_v21 = vld [vmem:[#allocation30_spill] sm:$0xff] }
 0x252   : > { %759 = vmatpush1.msra.mxu0 %v1428_v18  ;;  %830 = vmatpush1.msra.mxu1 %v1443_v23  ;;  %v1943_v18 = vld [vmem:[#allocation31_spill] sm:$0xff]  ;;  %v1948_v23 = vld [vmem:[#allocation33_spill] sm:$0xff] }
 0x253   : > { %760 = vmatprep.subr.mxu0 %v1434_v20  ;;  %831 = vmatprep.subr.mxu1 %v1449_v25  ;;  %v1945_v20 = vld [vmem:[#allocation32_spill] sm:$0xff] }
 0x254   : > { %761 = vmatpush1.msra.mxu0 %v1440_v22  ;;  %832 = vmatpush1.msra.mxu1 %v1455_v27  ;;  %v1947_v22 = vmov 0.0  }
 0x255   : > { %762 = vmatprep.subr.mxu0 %v1446_v24  ;;  %833 = vmatprep.subr.mxu1 %v1461_v29  ;;  %v1004_v24 = vld [vmem:[%s1371_s4 + $0x40] sm:$0xff] }
 0x256   : > { %763 = vmatpush1.msra.mxu0 %v1452_v26  ;;  %834 = vmatpush1.msra.mxu1 %v1467_v31  ;;  %v1005_v26 = vld [vmem:[%s1371_s4 + $0x48] sm:$0xff]  ;;  %v1006_v31 = vld [vmem:[%s1371_s4 + $0x50] sm:$0xff] }
 0x257   : > { %764 = vmatprep.subr.mxu0 %v1458_v28  ;;  %835 = vmatprep.subr.mxu1 %v1473_v33 }
 0x258   : > { %765 = vmatpush1.msra.mxu0 %v1464_v30  ;;  %836 = vmatpush1.msra.mxu1 %v1479_v35  ;;  %v1007_v35 = vld [vmem:[%s1371_s4 + $0x58] sm:$0xff] }
 0x259   : > { %766 = vmatprep.subr.mxu0 %v1470_v32  ;;  %837 = vmatprep.subr.mxu1 %v1485_v37 }
 0x25a   : > { %767 = vmatpush1.msra.mxu0 %v1476_v34  ;;  %838 = vmatpush1.msra.mxu1 %v1491_v39 }
 0x25b   : > { %768 = vmatprep.subr.mxu0 %v1482_v36  ;;  %839 = vmatprep.subr.mxu1 %v1497_v41 }
 0x25c   : > { %769 = vmatpush1.msra.mxu0 %v1488_v38  ;;  %840 = vmatpush1.msra.mxu1 %v1503_v43 }
 0x25d   : > { %770 = vmatprep.subr.mxu0 %v1494_v40  ;;  %841 = vmatprep.subr.mxu1 %v1509_v45 }
 0x25e   : > { %771 = vmatpush1.msra.mxu0 %v1500_v42  ;;  %842 = vmatpush1.msra.mxu1 %v1515_v47 }
 0x25f   : > { %772 = vmatprep.subr.mxu0 %v1506_v44  ;;  %843 = vmatprep.subr.mxu1 %v1929_v2 }
 0x260   : > { %773 = vmatpush1.msra.mxu0 %v1930_v3  ;;  %844 = vmatpush1.msra.mxu1 %v1931_v4 }
 0x261   : > { %774 = vmatprep.subr.mxu0 %v1932_v6  ;;  %845 = vmatprep.subr.mxu1 %v1933_v8 }
 0x262   : > { %775 = vmatpush1.msra.mxu0 %v1934_v9  ;;  %846 = vmatpush1.msra.mxu1 %v1935_v10 }
 0x263   : > { %776 = vmatprep.subr.mxu0 %v1936_v11  ;;  %847 = vmatprep.subr.mxu1 %v1937_v12 }
 0x264   : > { %777 = vmatpush1.msra.mxu0 %v1938_v13  ;;  %848 = vmatpush1.msra.mxu1 %v1939_v14 }
 0x265   : > { %778 = vmatprep.subr.mxu0 %v1940_v15  ;;  %849 = vmatprep.subr.mxu1 %v1941_v16 }
 0x266   : > { %779 = vmatpush1.msra.mxu0 %v1942_v17  ;;  %850 = vmatpush1.msra.mxu1 %v1943_v18 }
 0x267   : > { %780 = vmatprep.subr.mxu0 %v1944_v19  ;;  %851 = vmatprep.subr.mxu1 %v1945_v20 }
 0x268   : > { %781 = vmatpush1.msra.mxu0 %v1946_v21  ;;  %814 = vmatprep.mubr.f32.mxu0 %v1947_v22 }
 0x269   : > { %852 = vmatpush1.msra.mxu1 %v1948_v23  ;;  %885 = vmatprep.mubr.f32.mxu1 %v1947_v22 }
 0x309   : > { %v647_v25 = vpop.f32.mrf.mxu0  ;;  %v718_v32 = vpop.f32.mrf.mxu1 }
 0x30a   : > { %v723_v27 = vadd.f32 %v1004_v24, %v647_v25  ;;  %v725_v34 = vadd.f32 %v1006_v31, %v718_v32 }
 0x30b   : > { %v649_v28 = vpop.f32.mrf.mxu0  ;;  %v720_v36 = vpop.f32.mrf.mxu1 }
 0x30c   : > { %v727_v29 = vmul.f32 0.5, %v723_v27  ;;  %v724_v30 = vadd.f32 %v1005_v26, %v649_v28  ;;  %v726_v37 = vadd.f32 %v1007_v35, %v720_v36 }
 0x30e   : > { %1100 = vtanh.f32 %v727_v29  ;;  %v731_v33 = vmul.f32 0.5, %v724_v30  ;;  %v736_v38 = vmul.f32 0.5, %v726_v37 }
 0x310   : > { %1102 = vtanh.f32 %v731_v33 }
 0x311   : > { %1104 = vtanh.f32 %v725_v34 }
 0x312   : > { %1106 = vtanh.f32 %v736_v38 }
 0x31b   : > { %v1101_v39 = vpop.eup %1100 }
 0x31c   : > { %v729_v40 = vmul.f32 0.5, %v1101_v39 }
 0x31d   : > { %v1103_v41 = vpop.eup %1102 }
 0x31e   : > { %v730_v42 = vadd.f32 0.5, %v729_v40  ;;  %v733_v43 = vmul.f32 0.5, %v1103_v41  ;;  %v1105_v45 = vpop.eup %1104 }
 0x31f   : > { %v1107_v46 = vpop.eup %1106 }
 0x320   : > { %v734_v44 = vadd.f32 0.5, %v733_v43  ;;  %v741_v63 = vmul.f32 %v1105_v45, %v730_v42  ;;  %v738_v48 = vmul.f32 0.5, %v1107_v46 }
 0x322   : > { %v740_v47 = vmul.f32 %v734_v44, %v1723_v59  ;;  %v739_v49 = vadd.f32 0.5, %v738_v48 }
 0x324   : > { %v742_v7 = vadd.f32 %v741_v63, %v740_v47 }
 0x326   : > { %1108 = vtanh.f32 %v742_v7 }
 0x333   : > { %v1109_v52 = vpop.eup %1108 }
 0x334   : > { %v744_v55 = vmul.f32 %v1109_v52, %v739_v49 }
 0x336   : > { %815 = vmatmul.mubr.f32.vlgmr.msra.gmra.mxu0 %v744_v55  ;;  %886 = vmatmul.mubr.f32.vlgmr.msra.gmra.mxu1 %v744_v55 }
 0x3f6   : > { %v816_v1 = vpop.f32.mrf.mxu0  ;;  %v887_v59 = vpop.f32.mrf.mxu1 }
 0x3f7   : > { %v892_v61 = vadd.f32 %v1008_v54, %v816_v1  ;;  %v894_v57 = vadd.f32 %v1010_v60, %v887_v59 }
 0x3f8   : > { %v818_v56 = vpop.f32.mrf.mxu0  ;;  %v889_v5 = vpop.f32.mrf.mxu1 }
 0x3f9   : > { %v896_v62 = vmul.f32 0.5, %v892_v61  ;;  %v893_v0 = vadd.f32 %v1009_v58, %v818_v56  ;;  %v895_v50 = vadd.f32 %v1011_v51, %v889_v5 }
 0x3fb   : > { %1110 = vtanh.f32 %v896_v62  ;;  %v900_v53 = vmul.f32 0.5, %v893_v0  ;;  %v905_v2 = vmul.f32 0.5, %v895_v50 }
 0x3fd   : > { %1112 = vtanh.f32 %v900_v53 }
 0x3fe   : > { %1114 = vtanh.f32 %v894_v57 }
 0x3ff   : > { %1116 = vtanh.f32 %v905_v2 }
 0x408   : > { %v1111_v3 = vpop.eup %1110 }
 0x409   : > { %v898_v4 = vmul.f32 0.5, %v1111_v3 }
 0x40a   : > { %v1113_v6 = vpop.eup %1112 }
 0x40b   : > { %v899_v8 = vadd.f32 0.5, %v898_v4  ;;  %v902_v9 = vmul.f32 0.5, %v1113_v6  ;;  %v1115_v11 = vpop.eup %1114 }
 0x40c   : > { %v1117_v15 = vpop.eup %1116 }
 0x40d   : > { %v903_v10 = vadd.f32 0.5, %v902_v9  ;;  %v910_v13 = vmul.f32 %v1115_v11, %v899_v8  ;;  %v907_v16 = vmul.f32 0.5, %v1117_v15 }
 0x40f   : > { %v909_v12 = vmul.f32 %v903_v10, %v742_v7  ;;  %v908_v17 = vadd.f32 0.5, %v907_v16 }
 0x411   : > { %v911_v14 = vadd.f32 %v910_v13, %v909_v12 }
 0x413   : > { %1118 = vtanh.f32 %v911_v14  ;;  %915 = vst [vmem:[#allocation3] sm:$0xff] %v911_v14 }
 0x41f   : > { %919 = sbr.rel (%p1012_p0) target bundleno = 1061 (0x425), region = 44 }
 0x420   : > { %v1119_v18 = vpop.eup %1118 }
 0x421   : > { %v913_v19 = vmul.f32 %v1119_v18, %v908_v17 }
 0x423   : > { %914 = vst [vmem:[#allocation2] sm:$0xff] %v913_v19 }
 0x424   : > { %920 = vst [vmem:[#allocation9] sm:$0xff] %v913_v19 }
 0x425 PF: > { %p1040_p3 = scmp.eq.s32.totalorder %s1283_s13, 1  ;;  %s1248_s14 = smov [#allocation9]  }
 0x426   : > { %s928_s15 = sshll.u32 %s1248_s14, 4  ;;  %s929_s15 = int_to_ptr.vmem [resolvable:$true] %s928_s15 }
 0x427   : > { %s1174_s23 = scalar_lea.vmem %s929_s15, 128  ;;  %p1181_p11 = scmp.lt.s32.totalorder %s929_s15, %s929_s15 }
 0x428   : > { %p1175_p7 = scmp.ne.s32.totalorder %s929_s15, %s1174_s23  ;;  %p1182_p12 = scmp.lt.s32.totalorder %s1174_s23, %s1174_s23 }
 0x42a   : > { %p1176_p9 = pnand %p1175_p7, %p1040_p3  ;;  %p1183_p13 = por %p1182_p12, %p1181_p11 }
 0x42c   : > { %p1177_p10 = pneg %p1176_p9 }
 0x42e   : > { %p1184_p2 = pnand %p1183_p13, %p1177_p10 }
 0x430   : > { %1187 = shalt.err (!%p1184_p2)
}
 0x431   : > { %1026 = dma.vmem_to_hbm [thread:$0]  (%p1040_p3), %s929_s15, 128, %s1827_s2, [#allocation6]  }
 0x432   : > { %1223 = dma.done.wait (%p1040_p3), [#allocation6], 128  }
 0x433   : > { %1225 = vsyncadd (%p1040_p3), [#allocation6], 4294967168 }
 0x434 PF: > { %p14_p4 = scmp.ge.s32.totalorder %s1309_s19, 4   ;;  %s1949_s9 = smov %s1232_s10 }
 0x435   : > { %s1950_s10 = smov %s1236_s11  ;;  %s1951_s11 = smov %s1329_s27 }
 0x436   : > { %s1952_s12 = smov %s1309_s19  ;;  %16 = sbr.rel (!%p14_p4) target bundleno = 5 (0x5), region = 80 }
 0x43b   :  { %941 = vsyncpa [#allocation5], 1 }
 0x43c   :  { %943 = vsyncpa [#allocation5 + $0x1], 1 }
 0x43d   :  { %944 = vsyncpa [#allocation8], 1 }
 0x43e   :  { %945 = vsyncpa [#allocation6], 1 }
 0x43f   :  { %947 = vsyncpa [#allocation6 + $0x1], 1 }

</bundles_post_ra>
